<compile_context>
chip_gen: v7x
topology: tpu7x:2x2x1
jax: 0.10.0
libtpu: 0.0.40
codegen_flags: <defaults>
</compile_context>

<pallas_src>
import jax
import jax.numpy as jnp
from jax.experimental import pallas as pl
from jax.experimental.pallas import tpu as pltpu


def _make_head_kernel(num_classes: int):
    C = num_classes

    def kernel(hid_ref, pred_ref, cls_ref, lab_ref):
        # hid_ref: [bt, R, H]  (R >= C+1; rows >= C+1 are padding, never used)
        cls = hid_ref[:, 0, :]                      # [bt, H]
        lab = hid_ref[:, 1:C + 1, :]                # [bt, C, H]

        # Copy-out of the features straight from the slab already in VMEM.
        cls_ref[...] = cls
        lab_ref[...] = lab

        # predicts = einsum('bd,bcd->bc') with f32 accumulation.  C is a
        # small static class count -> unrolled loop keeps the live f32
        # intermediate at [bt, H] instead of a full [bt, C, H] temporary.
        cls_f32 = cls.astype(jnp.float32)
        cols = []
        for c in range(C):
            lab_c = lab[:, c, :].astype(jnp.float32)
            cols.append(jnp.sum(lab_c * cls_f32, axis=-1, keepdims=True))
        pred = jnp.concatenate(cols, axis=-1)       # [bt, C] f32
        pred_ref[...] = pred.astype(pred_ref.dtype)

    return kernel


def _physical_vmem_bytes() -> int:
    """Per-core physical VMEM; conservative 64 MiB (v7x-sized) on failure."""
    try:
        return int(pltpu.get_tpu_info().vmem_capacity_bytes)
    except Exception:
        return 64 << 20


def _per_row_bytes(C, H, R, itemsize):
    # Double-buffered input slab + double-buffered outputs + f32 compute
    # intermediates (cls_f32 + one lab column) per batch row.
    return 2 * (R * H + H + C * H + C) * itemsize + 8 * H


def transformer_head_forward(hiddens: jax.Array, num_classes: int):
    """Pallas implementation of the Transformer module's forward head.

    Args:
      hiddens: [B, S, H] last_hidden_state of the (external) base model.
      num_classes: C, number of classes (requires S >= C + 1).

    Returns:
      dict with 'predicts' [B, C], 'cls_feats' [B, H], 'label_feats' [B, C, H].
    """
    B, S, H = hiddens.shape
    C = num_classes
    assert S >= C + 1, "sequence length must be >= num_classes + 1"

    dtype = hiddens.dtype
    itemsize = jnp.dtype(dtype).itemsize

    # Kernel reads only the leading (C+1)-row slab of the sequence axis.
    # The second-to-last block dim must be a multiple of 8 or equal S.
    r_pad = ((C + 1 + 7) // 8) * 8
    R = r_pad if r_pad <= S else S

    # Generation-aware VMEM plan: ~80% of physical as the scoped limit,
    # minus headroom for compiler-internal scratch.
    phys = _physical_vmem_bytes()
    vmem_limit = max(32 << 20, int(phys * 0.8))
    plan_bytes = vmem_limit - (6 << 20)

    per_row = _per_row_bytes(C, H, R, itemsize)
    max_rows = max(1, plan_bytes // per_row)
    if B <= max_rows:
        bt = B                               # single block == full batch dim
    else:
        bt = max(8, (max_rows // 8) * 8)     # multiple of 8 for (8,128) rule

    # Megacore (v7x): guarantee >= 2 grid steps so the "parallel" batch axis
    # is sharded across both TensorCores.  Negligible cost on single-TC chips.
    if B >= 16:
        half = ((-(-B // 2) + 7) // 8) * 8
        bt = min(bt, half)

    # Corner case (very large C*H): ensure the limit covers one block-set.
    vmem_limit = int(max(vmem_limit, bt * per_row + (6 << 20)))

    grid = (pl.cdiv(B, bt),)

    bytes_accessed = B * R * H * itemsize + B * (C * H + H + C) * itemsize
    cost = pl.CostEstimate(flops=2 * B * C * H, transcendentals=0,
                           bytes_accessed=bytes_accessed)

    predicts, cls_feats, label_feats = pl.pallas_call(
        _make_head_kernel(C),
        out_shape=(
            jax.ShapeDtypeStruct((B, C), dtype),
            jax.ShapeDtypeStruct((B, H), dtype),
            jax.ShapeDtypeStruct((B, C, H), dtype),
        ),
        grid_spec=pltpu.PrefetchScalarGridSpec(
            num_scalar_prefetch=0,
            grid=grid,
            in_specs=[pl.BlockSpec((bt, R, H), lambda i: (i, 0, 0))],
            out_specs=[
                pl.BlockSpec((bt, C), lambda i: (i, 0)),
                pl.BlockSpec((bt, H), lambda i: (i, 0)),
                pl.BlockSpec((bt, C, H), lambda i: (i, 0, 0)),
            ],
        ),
        compiler_params=pltpu.CompilerParams(
            dimension_semantics=("parallel",),
            vmem_limit_bytes=vmem_limit,
        ),
        cost_estimate=cost,
    )(hiddens)

    return {
        "predicts": predicts,
        "cls_feats": cls_feats,
        "label_feats": label_feats,
    }


if __name__ == "__main__":
    # Small, deterministic synthetic shapes consistent with the module.
    B, S, H = 2, 8, 32          # batch, seq, hidden_size
    num_classes = 4             # needs S >= num_classes + 1

    key = jax.random.PRNGKey(0)
    hiddens = jax.random.normal(key, (B, S, H), dtype=jnp.float32)

    outputs = transformer_head_forward(hiddens, num_classes)
    jax.block_until_ready(outputs)

    # Reference check against plain-JAX semantics of the PyTorch forward.
    cls_ref = hiddens[:, 0, :]
    lab_ref = hiddens[:, 1:num_classes + 1, :]
    pred_ref = jnp.einsum("bd,bcd->bc", cls_ref, lab_ref)

    assert jnp.allclose(outputs["cls_feats"], cls_ref, atol=1e-6)
    assert jnp.allclose(outputs["label_feats"], lab_ref, atol=1e-6)
    assert jnp.allclose(outputs["predicts"], pred_ref, atol=1e-5)

    print("KERNEL_OK")
</pallas_src>

<mosaic_0001>
module attributes {stable_mosaic.version = 11 : i64} {
  func.func @kernel(%arg0: i32, %arg1: memref<2x8x32xf32, #tpu.memory_space<vmem>>, %arg2: memref<2x4xf32, #tpu.memory_space<vmem>>, %arg3: memref<2x32xf32, #tpu.memory_space<vmem>>, %arg4: memref<2x4x32xf32, #tpu.memory_space<vmem>>) attributes {dimension_semantics = [#tpu.dimension_semantics<parallel>], iteration_bounds = array<i64: 1>, scalar_prefetch = 0 : i64, scratch_operands = 0 : i64, tpu.core_type = #tpu.core_type<tc>, window_params = [{transform_indices = @transform_0, window_bounds = array<i64: 2, 8, 32>}, {transform_indices = @transform_1, window_bounds = array<i64: 2, 4>}, {transform_indices = @transform_2, window_bounds = array<i64: 2, 32>}, {transform_indices = @transform_3, window_bounds = array<i64: 2, 4, 32>}]} {
    %c0 = arith.constant 0 : index
    %c0_0 = arith.constant 0 : index
    %c0_1 = arith.constant 0 : index
    %0 = vector.load %arg1[%c0, %c0_0, %c0_1] : memref<2x8x32xf32, #tpu.memory_space<vmem>>, vector<2x1x32xf32>
    %1 = vector.shape_cast %0 : vector<2x1x32xf32> to vector<2x32xf32>
    %c0_2 = arith.constant 0 : index
    %c1 = arith.constant 1 : index
    %c0_3 = arith.constant 0 : index
    %2 = vector.load %arg1[%c0_2, %c1, %c0_3] : memref<2x8x32xf32, #tpu.memory_space<vmem>>, vector<2x4x32xf32>
    %c0_4 = arith.constant 0 : index
    %c0_5 = arith.constant 0 : index
    %3 = vector.load %arg3[%c0_4, %c0_5] : memref<2x32xf32, #tpu.memory_space<vmem>>, vector<2x32xf32>
    tpu.vector_store %arg3[%c0_4, %c0_5], %1 {strides = array<i32>} : memref<2x32xf32, #tpu.memory_space<vmem>>, vector<2x32xf32>,
    %c0_6 = arith.constant 0 : index
    %c0_7 = arith.constant 0 : index
    %c0_8 = arith.constant 0 : index
    %4 = vector.load %arg4[%c0_6, %c0_7, %c0_8] : memref<2x4x32xf32, #tpu.memory_space<vmem>>, vector<2x4x32xf32>
    tpu.vector_store %arg4[%c0_6, %c0_7, %c0_8], %2 {strides = array<i32>} : memref<2x4x32xf32, #tpu.memory_space<vmem>>, vector<2x4x32xf32>,
    %5 = vector.extract_strided_slice %2 {offsets = [0, 0, 0], sizes = [2, 1, 32], strides = [1, 1, 1]} : vector<2x4x32xf32> to vector<2x1x32xf32>
    %6 = vector.shape_cast %5 : vector<2x1x32xf32> to vector<2x32xf32>
    %7 = arith.mulf %6, %1 : vector<2x32xf32>
    %cst = arith.constant dense<0.000000e+00> : vector<2xf32>
    %8 = vector.multi_reduction <add>, %7, %cst [1] : vector<2x32xf32> to vector<2xf32>
    %9 = vector.shape_cast %8 : vector<2xf32> to vector<2x1xf32>
    %10 = vector.extract_strided_slice %2 {offsets = [0, 1, 0], sizes = [2, 1, 32], strides = [1, 1, 1]} : vector<2x4x32xf32> to vector<2x1x32xf32>
    %11 = vector.shape_cast %10 : vector<2x1x32xf32> to vector<2x32xf32>
    %12 = arith.mulf %11, %1 : vector<2x32xf32>
    %cst_9 = arith.constant dense<0.000000e+00> : vector<2xf32>
    %13 = vector.multi_reduction <add>, %12, %cst_9 [1] : vector<2x32xf32> to vector<2xf32>
    %14 = vector.shape_cast %13 : vector<2xf32> to vector<2x1xf32>
    %15 = vector.extract_strided_slice %2 {offsets = [0, 2, 0], sizes = [2, 1, 32], strides = [1, 1, 1]} : vector<2x4x32xf32> to vector<2x1x32xf32>
    %16 = vector.shape_cast %15 : vector<2x1x32xf32> to vector<2x32xf32>
    %17 = arith.mulf %16, %1 : vector<2x32xf32>
    %cst_10 = arith.constant dense<0.000000e+00> : vector<2xf32>
    %18 = vector.multi_reduction <add>, %17, %cst_10 [1] : vector<2x32xf32> to vector<2xf32>
    %19 = vector.shape_cast %18 : vector<2xf32> to vector<2x1xf32>
    %20 = vector.extract_strided_slice %2 {offsets = [0, 3, 0], sizes = [2, 1, 32], strides = [1, 1, 1]} : vector<2x4x32xf32> to vector<2x1x32xf32>
    %21 = vector.shape_cast %20 : vector<2x1x32xf32> to vector<2x32xf32>
    %22 = arith.mulf %21, %1 : vector<2x32xf32>
    %cst_11 = arith.constant dense<0.000000e+00> : vector<2xf32>
    %23 = vector.multi_reduction <add>, %22, %cst_11 [1] : vector<2x32xf32> to vector<2xf32>
    %24 = vector.shape_cast %23 : vector<2xf32> to vector<2x1xf32>
    %25 = tpu.concatenate %9, %14, %19, %24 in 1 : vector<2x1xf32>, vector<2x1xf32>, vector<2x1xf32>, vector<2x1xf32> -> vector<2x4xf32>
    %c0_12 = arith.constant 0 : index
    %c0_13 = arith.constant 0 : index
    %26 = vector.load %arg2[%c0_12, %c0_13] : memref<2x4xf32, #tpu.memory_space<vmem>>, vector<2x4xf32>
    tpu.vector_store %arg2[%c0_12, %c0_13], %25 {strides = array<i32>} : memref<2x4xf32, #tpu.memory_space<vmem>>, vector<2x4xf32>,
    return
  }
  func.func @transform_0(%arg0: i32) -> (i32, i32, i32) {
    %c0_i32 = arith.constant 0 : i32
    %c0_i32_0 = arith.constant 0 : i32
    %c0_i32_1 = arith.constant 0 : i32
    return %arg0, %c0_i32, %c0_i32_0 : i32, i32, i32
  }
  func.func @transform_1(%arg0: i32) -> (i32, i32) {
    %c0_i32 = arith.constant 0 : i32
    %c0_i32_0 = arith.constant 0 : i32
    return %arg0, %c0_i32 : i32, i32
  }
  func.func @transform_2(%arg0: i32) -> (i32, i32) {
    %c0_i32 = arith.constant 0 : i32
    %c0_i32_0 = arith.constant 0 : i32
    return %arg0, %c0_i32 : i32, i32
  }
  func.func @transform_3(%arg0: i32) -> (i32, i32, i32) {
    %c0_i32 = arith.constant 0 : i32
    %c0_i32_0 = arith.constant 0 : i32
    %c0_i32_1 = arith.constant 0 : i32
    return %arg0, %c0_i32, %c0_i32_0 : i32, i32, i32
  }
}

</mosaic_0001>

<bundles_post_ra>
// kernel: tpu_custom_call.1
= control target key start
LH: loop header
LB: loop body
LE: loop exit
PB: predicated region body
PF: predicated region fallthrough
CT: control target
= control target key end

     0   :  { %9 = vsyncpa [#allocation3], 0  ;;  %s343_s0 = inlined_call_operand.hbm [shape: f32[2,8,32], index: 0, kind: input, shape index: {}]   ;;  %s344_s1 = inlined_call_operand.hbm [shape: f32[2,4], index: 1, kind: output, shape index: {0}]   ;;  %s345_s2 = inlined_call_operand.hbm [shape: f32[2,32], index: 2, kind: output, shape index: {1}]   ;;  %s346_s3 = inlined_call_operand.hbm [shape: f32[2,4,32], index: 3, kind: output, shape index: {2}]  }
   0x1   :  { %10 = vsyncpa [#allocation4], 0 }
   0x2   :  { %11 = vsyncpa [#allocation7], 0  ;;  %s262_s12 = smov [#allocation2]   ;;  %s168_s16 = scalar_lea.hbm %s343_s0, 256 }
   0x3   :  { %s17_s13 = sshll.u32 %s262_s12, 4  ;;  %p169_p0 = scmp.ne.s32.totalorder %s343_s0, %s168_s16  ;;  %s18_s13 = int_to_ptr.vmem [resolvable:$true] %s17_s13 }
   0x4   :  { %p172_p1 = scmp.lt.u32.totalorder %s168_s16, %s343_s0 }
   0x6   :  { %p174_p2 = pnand %p172_p1, %p169_p0 }
   0x8   :  { %177 = shalt.err (!%p174_p2)
}
   0x9   :  { %s178_s21 = scalar_lea.vmem %s18_s13, 256  ;;  %p183_p4 = scmp.lt.s32.totalorder %s18_s13, %s18_s13 }
   0xa   :  { %p179_p3 = scmp.ne.s32.totalorder %s18_s13, %s178_s21  ;;  %p184_p5 = scmp.lt.s32.totalorder %s178_s21, %s178_s21 }
   0xc   :  { %p185_p6 = por %p184_p5, %p183_p4 }
   0xe   :  { %p186_p7 = pnand %p185_p6, %p179_p3 }
  0x10   :  { %189 = shalt.err (!%p186_p7)
}
  0x11   :  { %s263_s22 = smov 128   ;;  %s264_s23 = smov 8  }
  0x12   :  { %23 = dma.hbm_to_vmem [thread:$0]  %s343_s0, 256, %s18_s13, [#allocation3], %s263_s22, %s263_s22, %s264_s23  }
  0x13   :  { %256 = dma.done.wait [#allocation3], 256  }
  0x14   :  { %257 = vsyncadd [#allocation3], 4294967040  ;;  %vm60_vm0 = vcmask 1042434   ;;  %vm34_vm1 = vcmask 1041409   ;;  %v27_v0 = vld [vmem:[#allocation2] sm:$0x1] }
  0x15   :  { %v28_v1 = vld [vmem:[#allocation2 + $0x8] sm:$0x1]  ;;  %v29_v2 = vld [vmem:[#allocation2 + $0x1] sm:$0xf]  ;;  %v30_v3 = vld [vmem:[#allocation2 + $0x9] sm:$0xf] }
  0x16   :  { %v33_v4 = vrot.slane %v28_v1, 7  ;;  %v52_v5 = vrot.slane %v27_v0, 7  ;;  %v42_v6 = vmul.f32 %v29_v2, %v27_v0  ;;  %v67_v7 = vrot.slane %v27_v0, 6  ;;  %s265_s0 = smov [#allocation6]  }
  0x17   :  { %v43_v8 = vmul.f32 %v30_v3, %v28_v1  ;;  %v68_v9 = vrot.slane %v28_v1, 6  ;;  %v83_v10 = vrot.slane %v27_v0, 5  ;;  %v84_v11 = vrot.slane %v28_v1, 5  ;;  %s132_s26 = sshll.u32 %s265_s0, 4  ;;  %s133_s26 = int_to_ptr.vmem [resolvable:$true] %s132_s26 }
  0x18   :  { %v55_v12 = vmul.f32 %v52_v5, %v29_v2  ;;  %v56_v13 = vmul.f32 %v33_v4, %v30_v3  ;;  %vm37_vm2 = vcmask 254976   ;;  %v71_v14 = vmul.f32 %v67_v7, %v29_v2  ;;  %s190_s27 = scalar_lea.vmem %s133_s26, 32  ;;  %p195_p9 = scmp.lt.s32.totalorder %s133_s26, %s133_s26 }
  0x19   :  { %v46_v15 = vrot.slane %v43_v8, 7  ;;  %v72_v16 = vmul.f32 %v68_v9, %v30_v3  ;;  %v87_v17 = vmul.f32 %v83_v10, %v29_v2  ;;  %v88_v18 = vmul.f32 %v84_v11, %v30_v3  ;;  %p191_p8 = scmp.ne.s32.totalorder %s133_s26, %s190_s27  ;;  %p196_p10 = scmp.lt.s32.totalorder %s190_s27, %s190_s27 }
  0x1a   :  { %v59_v19 = vrot.slane %v56_v13, 7  ;;  %vm63_vm3 = vcmask 256001   ;;  %vm76_vm4 = vcmask 1043459   ;;  %vm92_vm5 = vcmask 1044484  }
  0x1b   :  { %v47_v20 = vsel %vm34_vm1, %v46_v15, %v42_v6  ;;  %v75_v21 = vrot.slane %v72_v16, 7  ;;  %v91_v22 = vrot.slane %v88_v18, 7  ;;  %vm95_vm6 = vcmask 258051   ;;  %p197_p11 = por %p196_p10, %p195_p9 }
  0x1c   :  { %v61_v23 = vsel %vm60_vm0, %v59_v19, %v55_v12  ;;  %v49_v24 = vsel %vm37_vm2, %v47_v20, 0.0  ;;  %vm79_vm7 = vcmask 257026   ;;  %v35_v30 = vsel %vm34_vm1, %v33_v4, %v27_v0 }
  0x1d   :  { %v64_v25 = vsel %vm63_vm3, %v61_v23, 0.0  ;;  %50 = vadd.xlane.f32.xlu1 %v49_v24  ;;  %v77_v26 = vsel %vm76_vm4, %v75_v21, %v71_v14  ;;  %v93_v27 = vsel %vm92_vm5, %v91_v22, %v87_v17  ;;  %38 = vst.msk [vmem:[#allocation6] sm:$0x3] %vm37_vm2, %v35_v30  ;;  %vm39_vm8 = vcmask 257024   ;;  %p198_p12 = pnand %p197_p11, %p191_p8 }
  0x1e   :  { %65 = vadd.xlane.f32.xlu0 %v64_v25  ;;  %v96_v28 = vsel %vm95_vm6, %v93_v27, 0.0  ;;  %v80_v29 = vsel %vm79_vm7, %v77_v26, 0.0 }
  0x21   :  { %97 = vadd.xlane.f32.xlu1 %v96_v28 }
  0x22   :  { %81 = vadd.xlane.f32.xlu0 %v80_v29 }
  0x23   :  { %201 = shalt.err (!%p198_p12)
}
  0x24   :  { %s202_s30 = scalar_lea.hbm %s345_s2, 32 }
  0x25   :  { %p203_p13 = scmp.ne.s32.totalorder %s345_s2, %s202_s30  ;;  %p206_p0 = scmp.lt.u32.totalorder %s202_s30, %s345_s2 }
  0x27   :  { %p208_p1 = pnand %p206_p0, %p203_p13 }
  0x29   :  { %211 = shalt.err (!%p208_p1)
}
  0x2a   :  { %135 = dma.vmem_to_hbm [thread:$0]  %s133_s26, 32, %s345_s2, [#allocation7]   ;;  %40 = vst.msk [vmem:[#allocation8] sm:$0xf] %vm39_vm8, %v29_v2  ;;  %41 = vst.msk [vmem:[#allocation8 + $0x4] sm:$0xf] %vm39_vm8, %v30_v3 }
  0x2b   :  { %s266_s10 = smov [#allocation8]  }
  0x2c   :  { %s141_s11 = sshll.u32 %s266_s10, 4  ;;  %s142_s11 = int_to_ptr.vmem [resolvable:$true] %s141_s11 }
  0x2d   :  { %s212_s12 = scalar_lea.vmem %s142_s11, 128  ;;  %p217_p3 = scmp.lt.s32.totalorder %s142_s11, %s142_s11 }
  0x2e   :  { %p213_p2 = scmp.ne.s32.totalorder %s142_s11, %s212_s12  ;;  %p218_p4 = scmp.lt.s32.totalorder %s212_s12, %s212_s12 }
  0x30   :  { %p219_p5 = por %p218_p4, %p217_p3 }
  0x32   :  { %p220_p6 = pnand %p219_p5, %p213_p2 }
  0x34   :  { %223 = shalt.err (!%p220_p6)
}
  0x35   :  { %s224_s15 = scalar_lea.hbm %s346_s3, 128 }
  0x36   :  { %p225_p7 = scmp.ne.s32.totalorder %s346_s3, %s224_s15  ;;  %p228_p8 = scmp.lt.u32.totalorder %s224_s15, %s346_s3 }
  0x38   :  { %p230_p9 = pnand %p228_p8, %p225_p7 }
  0x3a   :  { %233 = shalt.err (!%p230_p9)
}
  0x3b   :  { %s267_s19 = smov 64   ;;  %s268_s20 = smov 4   ;;  %vm108_vm9 = vcmask 7168   ;;  %vm110_vm10 = vcmask 15360   ;;  %vm112_vm11 = vcmask 23552   ;;  %vm114_vm12 = vcmask 25600  }
  0x3c   :  { %147 = dma.vmem_to_hbm [thread:$0]  %s142_s11, 128, %s346_s3, [#allocation7], %s267_s19, %s267_s19, %s268_s20  }
  0x3d   :  { %s269_s23 = smov [#allocation5]  }
  0x3e   :  { %s122_s24 = sshll.u32 %s269_s23, 4  ;;  %s123_s24 = int_to_ptr.vmem [resolvable:$true] %s122_s24 }
  0x3f   :  { %s234_s25 = scalar_lea.vmem %s123_s24, 32  ;;  %p239_p11 = scmp.lt.s32.totalorder %s123_s24, %s123_s24 }
  0x40   :  { %p235_p10 = scmp.ne.s32.totalorder %s123_s24, %s234_s25  ;;  %p240_p12 = scmp.lt.s32.totalorder %s234_s25, %s234_s25 }
  0x42   :  { %p241_p13 = por %p240_p12, %p239_p11 }
  0x44   :  { %p242_p0 = pnand %p241_p13, %p235_p10 }
  0xaa   :  { %v51_v31 = vpop.xlane.xlu1 %50 }
  0xab   :  { %v66_v32 = vpop.xlane.xlu0 %65 }
  0xac   :  { %v100_v33 = vrot.slane %v66_v32, 1 }
  0xae   :  { %v98_v34 = vpop.xlane.xlu1 %97  ;;  %v109_v38 = vsel %vm108_vm9, %v51_v31, %v100_v33 }
  0xaf   :  { %v82_v35 = vpop.xlane.xlu0 %81  ;;  %v106_v36 = vrot.slane %v98_v34, 3 }
  0xb0   :  { %v103_v37 = vrot.slane %v82_v35, 2 }
  0xb2   :  { %v111_v39 = vsel %vm110_vm10, %v109_v38, %v103_v37 }
  0xb3   :  { %v113_v40 = vsel %vm112_vm11, %v111_v39, %v106_v36 }
  0xb4   :  { %115 = vst.msk [vmem:[#allocation5] sm:$0x3] %vm114_vm12, %v113_v40 }
  0xb5   :  { %245 = shalt.err (!%p242_p0)
}
  0xb6   :  { %s246_s26 = scalar_lea.hbm %s344_s1, 32 }
  0xb7   :  { %p247_p1 = scmp.ne.s32.totalorder %s344_s1, %s246_s26  ;;  %p250_p2 = scmp.lt.u32.totalorder %s246_s26, %s344_s1 }
  0xb9   :  { %p252_p3 = pnand %p250_p2, %p247_p1 }
  0xbb   :  { %255 = shalt.err (!%p252_p3)
}
  0xbc   :  { %125 = dma.vmem_to_hbm [thread:$0]  %s123_s24, 32, %s344_s1, [#allocation4]  }
  0xbd   :  { %258 = dma.done.wait [#allocation4], 32  }
  0xbe   :  { %259 = vsyncadd [#allocation4], 4294967264 }
  0xbf   :  { %260 = dma.done.wait [#allocation7], 160  }
  0xc0   :  { %261 = vsyncadd [#allocation7], 4294967136 }
  0xc1   :  { %157 = vsyncpa [#allocation3], 1 }
  0xc2   :  { %158 = vsyncpa [#allocation4], 1 }
  0xc3   :  { %159 = vsyncpa [#allocation7], 1 }

</bundles_post_ra>
